<compile_context>
chip_gen: v7x
topology: tpu7x:2x2x1
jax: 0.10.0
libtpu: 0.0.40
codegen_flags: <defaults>
</compile_context>

<pallas_src>
import functools
import math

import jax
import jax.numpy as jnp
from jax.experimental import pallas as pl
from jax.experimental.pallas import tpu as pltpu

F32 = jnp.float32
NOISE_MEAN = 0.0
NOISE_STDEV = 1.6569279459762971

_VMEM = pl.BlockSpec(memory_space=pltpu.MemorySpace.VMEM)
_SMEM = pl.BlockSpec(memory_space=pltpu.MemorySpace.SMEM)

# Largest kernel footprints: fc1 weight tile (3584x1024 f32, double buffered)
# ~29 MiB; 512->512 conv weight (4608x512 f32, double buffered) ~19 MiB.
# 40 MiB fits every generation (v5e/v6e 128 MiB, v7x 64 MiB physical VMEM).
_VMEM_LIMIT_BYTES = 40 * 1024 * 1024

# (v + 1.5*2^23) - 1.5*2^23 == round-half-to-even(v) in f32 for |v| < 2^22.
# Everything passed to round() here is bounded by a few hundred, so this is an
# exact reproduction of torch.round (relies on default, non-fast-math XLA).
_RNE_MAGIC = 12582912.0


def _rne(v):
    return (v + _RNE_MAGIC) - _RNE_MAGIC


def _sign(v):
    # torch.sign semantics (sign(+-0) == 0) with plain selects.
    return jnp.where(v > 0.0, 1.0, jnp.where(v < 0.0, -1.0, 0.0))


def _round_up(x, m):
    return (x + m - 1) // m * m


# ----------------------------------------------------------------------------
# Fused 3x3 conv kernel (im2col-free) with bias + max|y| epilogue
# ----------------------------------------------------------------------------
def _conv3x3_kernel(xf_ref, w_ref, b_ref, o_ref, mx_ref, *, H, W, Cin, Cout):
    """One image: 3x3/pad-1 conv as 9 shifted MXU matmuls.

    xf_ref: (H*W + 2*W + 2, Cin) zero-margined, flattened-spatial activation
            (padded element q <-> original flat index q - (W + 1)).
    w_ref : (9*Cin, Cout)  rows grouped per tap (kh*3 + kw).
    b_ref : (1, Cout)      bias already multiplied by the previous scale.
    o_ref : (H*W, Cout)    conv output for this image.
    mx_ref: (1, 1)         running max(|y|) across the batch grid axis.
    """
    n = pl.program_id(0)
    HW = H * W

    col = jax.lax.broadcasted_iota(jnp.int32, (HW, 1), 0) % W
    mask_l = (col != 0).astype(F32)        # kw == 0 taps: col 0 reads W-pad
    mask_r = (col != W - 1).astype(F32)    # kw == 2 taps: col W-1 reads W-pad

    o_ref[...] = jnp.zeros_like(o_ref)
    for kh in range(3):
        for kw in range(3):
            xs = xf_ref[pl.ds(kh * W + kw, HW), :]
            if kw == 0:
                xs = xs * mask_l
            elif kw == 2:
                xs = xs * mask_r
            wt = w_ref[pl.ds((kh * 3 + kw) * Cin, Cin), :]
            o_ref[...] += jnp.dot(xs, wt, preferred_element_type=jnp.float32)

    y = o_ref[...] + b_ref[...]
    o_ref[...] = y
    m = jnp.max(jnp.abs(y), axis=(0, 1), keepdims=True)

    @pl.when(n == 0)
    def _():
        mx_ref[...] = m

    @pl.when(n != 0)
    def _():
        mx_ref[...] = jnp.maximum(mx_ref[...], m)


def conv3x3(x_nhwc, w_kc, bias_row):
    """3x3 stride-1 pad-1 conv; returns ((N, H*W, Cout), max|y| as (1, 1))."""
    n, h, w, c = x_nhwc.shape
    cout = w_kc.shape[1]
    hw = h * w
    L = hw + 2 * w + 2
    # Single 1x copy: flatten spatial dims and add (W+1)-wide zero margins.
    xf = jnp.pad(x_nhwc.reshape(n, hw, c), ((0, 0), (w + 1, w + 1), (0, 0)))

    kernel = functools.partial(_conv3x3_kernel, H=h, W=w, Cin=c, Cout=cout)
    y, mx = pl.pallas_call(
        kernel,
        out_shape=(jax.ShapeDtypeStruct((n, hw, cout), F32),
                   jax.ShapeDtypeStruct((1, 1), F32)),
        grid_spec=pltpu.PrefetchScalarGridSpec(
            num_scalar_prefetch=0,
            grid=(n,),
            in_specs=[
                pl.BlockSpec((None, L, c), lambda i: (i, 0, 0)),
                pl.BlockSpec((9 * c, cout), lambda i: (0, 0)),
                pl.BlockSpec((1, cout), lambda i: (0, 0)),
            ],
            out_specs=[
                pl.BlockSpec((None, hw, cout), lambda i: (i, 0, 0)),
                pl.BlockSpec((1, 1), lambda i: (0, 0)),
            ],
        ),
        compiler_params=pltpu.CompilerParams(
            dimension_semantics=("arbitrary",),  # max|y| accumulates across N
            vmem_limit_bytes=_VMEM_LIMIT_BYTES),
    )(xf, w_kc, bias_row)
    return y, mx


# ----------------------------------------------------------------------------
# FC matmul kernel with bias + max|y| epilogue
# ----------------------------------------------------------------------------
def _fc_kernel(a_ref, b_ref, bias_ref, o_ref, mx_ref, *, m_valid):
    j = pl.program_id(0)            # output-column tile
    k = pl.program_id(1)            # reduction tile (innermost)

    @pl.when(k == 0)
    def _():
        o_ref[...] = jnp.zeros_like(o_ref) + bias_ref[...]

    o_ref[...] += jnp.dot(a_ref[...], b_ref[...],
                          preferred_element_type=jnp.float32)

    last = k == pl.num_programs(1) - 1

    def _tile_max():
        y = o_ref[...]
        rows = jax.lax.broadcasted_iota(jnp.int32, y.shape, 0)
        # Exclude rows that only exist because M was padded to a sublane mult.
        return jnp.max(jnp.where(rows < m_valid, jnp.abs(y), 0.0),
                       axis=(0, 1), keepdims=True)

    @pl.when(last & (j == 0))
    def _():
        mx_ref[...] = _tile_max()

    @pl.when(last & (j != 0))
    def _():
        mx_ref[...] = jnp.maximum(mx_ref[...], _tile_max())


def fc_layer(a, w_kn, bias_vec, *, tn, tk):
    """y = a @ w_kn + bias;  also returns max(|y|) over the valid rows."""
    M, K = a.shape
    N = w_kn.shape[1]
    Mp = _round_up(max(M, 8), 8)
    Kp = _round_up(K, tk)
    Np = _round_up(N, tn)

    a_p = a if (Mp, Kp) == (M, K) else jnp.pad(a, ((0, Mp - M), (0, Kp - K)))
    b_p = w_kn if (Kp, Np) == (K, N) else jnp.pad(
        w_kn, ((0, Kp - K), (0, Np - N)))
    bias_p = bias_vec.reshape(1, N)
    if Np != N:
        bias_p = jnp.pad(bias_p, ((0, 0), (0, Np - N)))

    y, mx = pl.pallas_call(
        functools.partial(_fc_kernel, m_valid=M),
        out_shape=(jax.ShapeDtypeStruct((Mp, Np), F32),
                   jax.ShapeDtypeStruct((1, 1), F32)),
        grid_spec=pltpu.PrefetchScalarGridSpec(
            num_scalar_prefetch=0,
            grid=(Np // tn, Kp // tk),
            in_specs=[
                pl.BlockSpec((Mp, tk), lambda j, k: (0, k)),
                pl.BlockSpec((tk, tn), lambda j, k: (k, j)),
                pl.BlockSpec((1, tn), lambda j, k: (0, j)),
            ],
            out_specs=[
                pl.BlockSpec((Mp, tn), lambda j, k: (0, j)),
                pl.BlockSpec((1, 1), lambda j, k: (0, 0)),
            ],
        ),
        compiler_params=pltpu.CompilerParams(
            dimension_semantics=("arbitrary", "arbitrary"),
            vmem_limit_bytes=_VMEM_LIMIT_BYTES),
    )(a_p, b_p, bias_p)
    return y[:M, :N], mx


# ----------------------------------------------------------------------------
# Element-wise kernels (convert_float8 / noise / ReLU / dropout / round)
# ----------------------------------------------------------------------------
def _convert_f8_kernel(x_ref, q_ref, s_ref):
    mx = jnp.max(jnp.abs(x_ref[...]), axis=(0, 1), keepdims=True)
    s = 255.0 / mx            # same behavior as the torch reference (inf if all-zero)
    q_ref[...] = _rne(x_ref[...] * s)
    s_ref[...] = s


def convert_float8(x2d):
    q, s = pl.pallas_call(
        _convert_f8_kernel,
        out_shape=(jax.ShapeDtypeStruct(x2d.shape, F32),
                   jax.ShapeDtypeStruct((1, 1), F32)),
    )(x2d)
    return q, s[0, 0]


def _qnoise_kernel(y_ref, s_ref, noise_ref, o_ref, *, relu):
    q = _rne(y_ref[...] * s_ref[0, 0])
    z = _sign(q) * jnp.abs(jnp.abs(q) + noise_ref[...])
    if relu:
        z = jnp.maximum(z, 0.0)
    o_ref[...] = _rne(z)


def _qnoise_relu_drop_kernel(y_ref, s_ref, noise_ref, mask_ref, o_ref):
    q = _rne(y_ref[...] * s_ref[0, 0])
    z = _sign(q) * jnp.abs(jnp.abs(q) + noise_ref[...])
    z = jnp.maximum(z, 0.0)
    z = z * mask_ref[...]          # dropout mask already scaled by 1/keep
    o_ref[...] = _rne(z)


def quant_noise_act(y2d, scale, noise, *, relu):
    return pl.pallas_call(
        functools.partial(_qnoise_kernel, relu=relu),
        out_shape=jax.ShapeDtypeStruct(y2d.shape, F32),
        in_specs=[_VMEM, _SMEM, _VMEM],
        out_specs=_VMEM,
    )(y2d, jnp.reshape(scale, (1, 1)), noise)


def quant_noise_relu_drop(y2d, scale, noise, mask):
    return pl.pallas_call(
        _qnoise_relu_drop_kernel,
        out_shape=jax.ShapeDtypeStruct(y2d.shape, F32),
        in_specs=[_VMEM, _SMEM, _VMEM, _VMEM],
        out_specs=_VMEM,
    )(y2d, jnp.reshape(scale, (1, 1)), noise, mask)


# ----------------------------------------------------------------------------
# JAX glue (pooling / RNG sample generation)
# ----------------------------------------------------------------------------
def maxpool2x2(x):  # NHWC, kernel 2, stride 2
    n, h, w, c = x.shape
    return jnp.max(x.reshape(n, h // 2, 2, w // 2, 2, c), axis=(2, 4))


def adaptive_avg_pool_7x7(x):  # NHWC -> (N, 7, 7, C), PyTorch adaptive formula
    n, h, w, c = x.shape

    def bounds(size):
        return [((i * size) // 7, -((-(i + 1) * size) // 7)) for i in range(7)]

    rows = []
    for hs, he in bounds(h):
        cols = []
        for ws, we in bounds(w):
            cols.append(jnp.mean(x[:, hs:he, ws:we, :], axis=(1, 2),
                                 keepdims=True))
        rows.append(jnp.concatenate(cols, axis=2))
    return jnp.concatenate(rows, axis=1)


# ----------------------------------------------------------------------------
# Model
# ----------------------------------------------------------------------------
_CONV_CFG = [(3, 64), (64, 64), (64, 128), (128, 128), (128, 256), (256, 256),
             (256, 256), (256, 512), (512, 512), (512, 512), (512, 512),
             (512, 512), (512, 512)]
_POOL_AFTER = {2, 4, 7, 10, 13}


def init_params(key, num_classes=1000):
    """Random parameters in the PyTorch layouts (OIHW conv, (out, in) linear)."""
    params = {}
    keys = jax.random.split(key, 2 * (len(_CONV_CFG) + 3))
    idx = 0
    for i, (cin, cout) in enumerate(_CONV_CFG, start=1):
        w = jax.random.normal(keys[idx], (cout, cin, 3, 3), F32) / math.sqrt(cin * 9)
        idx += 1
        b = jax.random.normal(keys[idx], (cout,), F32) * 0.1
        idx += 1
        params[f"conv{i}"] = (w, b)
    for name, fin, fout in [("fc1", 512 * 7 * 7, 4096),
                            ("fc2", 4096, 4096),
                            ("fc3", 4096, num_classes)]:
        w = jax.random.normal(keys[idx], (fout, fin), F32) / math.sqrt(fin)
        idx += 1
        b = jax.random.normal(keys[idx], (fout,), F32) * 0.1
        idx += 1
        params[name] = (w, b)
    return params


def prepare_params(params):
    """One-time layout conversion (done OUTSIDE the per-step forward):
    conv weights -> (9*Cin_padded, Cout) matmul weights, fc -> (K, N)."""
    prepared = {}
    for i in range(1, len(_CONV_CFG) + 1):
        w, b = params[f"conv{i}"]                  # (Cout, Cin, 3, 3)
        cout, cin = w.shape[0], w.shape[1]
        cin_p = _round_up(cin, 8)                  # pad tiny Cin (layer 1 only)
        wt = jnp.transpose(w, (2, 3, 1, 0))        # (3, 3, Cin, Cout)
        if cin_p != cin:
            wt = jnp.pad(wt, ((0, 0), (0, 0), (0, cin_p - cin), (0, 0)))
        prepared[f"conv{i}"] = (wt.reshape(9 * cin_p, cout), b)
    for name in ("fc1", "fc2", "fc3"):
        w, b = params[name]                        # (out, in)
        prepared[name] = (jnp.transpose(w), b)     # (in, out)
    return prepared


def vgg16_8bit_noise_forward(params, x_nchw, key, *, dropout_p=0.5,
                             training=True):
    """Reproduces VGG16_8bit_noise.forward (training-mode dropout)."""
    keys = jax.random.split(key, 32)
    ki = iter(range(32))

    n = x_nchw.shape[0]
    x = jnp.transpose(x_nchw, (0, 2, 3, 1)).astype(F32)        # NCHW -> NHWC
    if x.shape[-1] < 8:                        # match the padded conv1 weights
        x = jnp.pad(x, ((0, 0), (0, 0), (0, 0), (0, 8 - x.shape[-1])))

    # convert_float8_input: fused max(|x|) + round(x*s) on a lane-dense view.
    nn_, hh, ww_, cc = x.shape
    xq, s = convert_float8(x.reshape(nn_, hh * ww_ * cc))
    x = xq.reshape(nn_, hh, ww_, cc)

    # 13 conv blocks: conv(+s*bias) with fused max|y| -> quantize -> signed
    # noise -> ReLU -> round -> [2x2 max-pool].  round() is monotone, so
    # applying it before the max-pool is exact.
    for li in range(1, 14):
        w_kc, b = params[f"conv{li}"]
        cout = w_kc.shape[1]
        _, h, w, _ = x.shape
        y3, mx = conv3x3(x, w_kc, (s * b).reshape(1, cout))
        s = 255.0 / mx[0, 0]
        y2 = y3.reshape(n, h * w * cout)                       # lane-dense view
        noise = (jax.random.normal(keys[next(ki)], y2.shape, F32)
                 * NOISE_STDEV + NOISE_MEAN)
        y2 = quant_noise_act(y2, s, noise, relu=True)
        y = y2.reshape(n, h, w, cout)
        if li in _POOL_AFTER:
            y = maxpool2x2(y)
        x = y

    # avgpool -> flatten (NCHW order, as torch.flatten) -> convert_float8
    x = adaptive_avg_pool_7x7(x)                               # (N, 7, 7, 512)
    flat = jnp.transpose(x, (0, 3, 1, 2)).reshape(n, -1)       # (N, 25088)
    flat, s = convert_float8(flat)

    keep = 1.0 - dropout_p

    def dropout_mask(shape, k):
        if training:
            return jax.random.bernoulli(k, keep, shape).astype(F32) / keep
        return jnp.ones(shape, F32)

    # fc1
    w_kn, b = params["fc1"]
    y, mx = fc_layer(flat, w_kn, s * b, tn=1024, tk=3584)
    s = 255.0 / mx[0, 0]
    noise = (jax.random.normal(keys[next(ki)], y.shape, F32)
             * NOISE_STDEV + NOISE_MEAN)
    y = quant_noise_relu_drop(y, s, noise, dropout_mask(y.shape, keys[next(ki)]))

    # fc2
    w_kn, b = params["fc2"]
    y, mx = fc_layer(y, w_kn, s * b, tn=1024, tk=2048)
    s = 255.0 / mx[0, 0]
    noise = (jax.random.normal(keys[next(ki)], y.shape, F32)
             * NOISE_STDEV + NOISE_MEAN)
    y = quant_noise_relu_drop(y, s, noise, dropout_mask(y.shape, keys[next(ki)]))

    # fc3 (no ReLU, no dropout)
    w_kn, b = params["fc3"]
    y, mx = fc_layer(y, w_kn, s * b,
                     tn=min(1024, _round_up(w_kn.shape[1], 128)), tk=4096)
    s = 255.0 / mx[0, 0]
    noise = (jax.random.normal(keys[next(ki)], y.shape, F32)
             * NOISE_STDEV + NOISE_MEAN)
    y = quant_noise_act(y, s, noise, relu=False)
    return y


if __name__ == "__main__":
    key = jax.random.PRNGKey(0)
    pkey, xkey, nkey = jax.random.split(key, 3)

    num_classes = 128
    params = prepare_params(init_params(pkey, num_classes=num_classes))

    # batch=2, 3 channels, 32x32 spatial: the smallest spatial size that
    # survives the five stride-2 max-pools of VGG16.
    x = jax.random.normal(xkey, (2, 3, 32, 32), F32)

    out = vgg16_8bit_noise_forward(params, x, nkey, dropout_p=0.5,
                                   training=True)
    out = jax.block_until_ready(out)
    assert out.shape == (2, num_classes), out.shape
    assert bool(jnp.all(jnp.isfinite(out)))
    print("KERNEL_OK")
</pallas_src>

<mosaic_0001>
module attributes {stable_mosaic.version = 11 : i64} {
  func.func @_convert_f8_kernel(%arg0: memref<2x8192xf32, #tpu.memory_space<vmem>>, %arg1: memref<2x8192xf32, #tpu.memory_space<vmem>>, %arg2: memref<1x1xf32, #tpu.memory_space<vmem>>) attributes {dimension_semantics = [], scalar_prefetch = 0 : i64, scratch_operands = 0 : i64, tpu.core_type = #tpu.core_type<tc>} {
    %c0 = arith.constant 0 : index
    %c0_0 = arith.constant 0 : index
    %0 = vector.load %arg0[%c0, %c0_0] : memref<2x8192xf32, #tpu.memory_space<vmem>>, vector<2x8192xf32>
    %1 = math.absf %0 : vector<2x8192xf32>
    %2 = vector.shape_cast %1 : vector<2x8192xf32> to vector<1x2x8192xf32>
    %cst = arith.constant dense<0xFF800000> : vector<1xf32>
    %3 = vector.multi_reduction <maximumf>, %2, %cst [1, 2] : vector<1x2x8192xf32> to vector<1xf32>
    %4 = vector.shape_cast %3 : vector<1xf32> to vector<1x1x1xf32>
    %5 = vector.extract %4[0, 0, 0] : f32 from vector<1x1x1xf32>
    %6 = vector.broadcast %5 : f32 to vector<1x1xf32>
    %cst_1 = arith.constant 2.550000e+02 : f32
    %7 = vector.broadcast %cst_1 : f32 to vector<1x1xf32>
    %8 = arith.divf %7, %6 : vector<1x1xf32>
    %c0_2 = arith.constant 0 : index
    %c0_3 = arith.constant 0 : index
    %9 = vector.load %arg0[%c0_2, %c0_3] : memref<2x8192xf32, #tpu.memory_space<vmem>>, vector<2x8192xf32>
    %10 = vector.broadcast %8 : vector<1x1xf32> to vector<2x8192xf32>
    %11 = arith.mulf %9, %10 : vector<2x8192xf32>
    %cst_4 = arith.constant 0x4B400000 : f32
    %12 = vector.broadcast %cst_4 : f32 to vector<2x8192xf32>
    %13 = arith.addf %11, %12 : vector<2x8192xf32>
    %cst_5 = arith.constant 0x4B400000 : f32
    %14 = vector.broadcast %cst_5 : f32 to vector<2x8192xf32>
    %15 = arith.subf %13, %14 : vector<2x8192xf32>
    %c0_6 = arith.constant 0 : index
    %c0_7 = arith.constant 0 : index
    %16 = vector.load %arg1[%c0_6, %c0_7] : memref<2x8192xf32, #tpu.memory_space<vmem>>, vector<2x8192xf32>
    tpu.vector_store %arg1[%c0_6, %c0_7], %15 {strides = array<i32>} : memref<2x8192xf32, #tpu.memory_space<vmem>>, vector<2x8192xf32>,
    %c0_8 = arith.constant 0 : index
    %c0_9 = arith.constant 0 : index
    %17 = vector.load %arg2[%c0_8, %c0_9] : memref<1x1xf32, #tpu.memory_space<vmem>>, vector<1x1xf32>
    tpu.vector_store %arg2[%c0_8, %c0_9], %8 {strides = array<i32>} : memref<1x1xf32, #tpu.memory_space<vmem>>, vector<1x1xf32>,
    return
  }
}

</mosaic_0001>

<bundles_post_ra>
// kernel: tpu_custom_call.1
= control target key start
LH: loop header
LB: loop body
LE: loop exit
PB: predicated region body
PF: predicated region fallthrough
CT: control target
= control target key end

     0   :  { %8 = vsyncpa [#allocation3], 0  ;;  %s1227_s0 = inlined_call_operand.hbm [shape: f32[2,8192], index: 0, kind: input, shape index: {}]   ;;  %s1228_s1 = inlined_call_operand.hbm [shape: f32[2,8192], index: 1, kind: output, shape index: {0}]   ;;  %s1229_s2 = inlined_call_operand.hbm [shape: f32[1,1], index: 2, kind: output, shape index: {1}]  }
   0x1   :  { %9 = vsyncpa [#allocation4], 0 }
   0x2   :  { %10 = vsyncpa [#allocation7], 0  ;;  %s739_s9 = smov [#allocation2]   ;;  %s667_s13 = scalar_lea.hbm %s1227_s0, 2048 }
   0x3   :  { %s17_s10 = sshll.u32 %s739_s9, 4  ;;  %p668_p0 = scmp.ne.s32.totalorder %s1227_s0, %s667_s13  ;;  %s18_s10 = int_to_ptr.vmem [resolvable:$true] %s17_s10 }
   0x4   :  { %p671_p1 = scmp.lt.u32.totalorder %s667_s13, %s1227_s0 }
   0x6   :  { %p673_p2 = pnand %p671_p1, %p668_p0 }
   0x8   :  { %676 = shalt.err (!%p673_p2)
}
   0x9   :  { %s677_s18 = scalar_lea.vmem %s18_s10, 2048  ;;  %p682_p4 = scmp.lt.s32.totalorder %s18_s10, %s18_s10 }
   0xa   :  { %p678_p3 = scmp.ne.s32.totalorder %s18_s10, %s677_s18  ;;  %p683_p5 = scmp.lt.s32.totalorder %s677_s18, %s677_s18 }
   0xc   :  { %p684_p6 = por %p683_p5, %p682_p4 }
   0xe   :  { %p685_p7 = pnand %p684_p6, %p678_p3 }
  0x10   :  { %688 = shalt.err (!%p685_p7)
}
  0x11   :  { %20 = dma.hbm_to_vmem [thread:$0]  %s1227_s0, 2048, %s18_s10, [#allocation3]  }
  0x12   :  { %733 = dma.done.wait [#allocation3], 2048  }
  0x13   :  { %734 = vsyncadd [#allocation3], 4294965248  ;;  %v76_v0 = vlaneseq  ;;  %v740_v1 = vmov 1983009808   ;;  %v772_v6 = vld [vmem:[#allocation2] sm:$0xff]  ;;  %v774_v7 = vld [vmem:[#allocation2 + $0x8] sm:$0xff] }
  0x14   :  { %v74_v2 = vunpack.c.l.s4 %v740_v1  ;;  %v776_v8 = vld [vmem:[#allocation2 + $0x10] sm:$0xff]  ;;  %v778_v9 = vld [vmem:[#allocation2 + $0x18] sm:$0xff]  ;;  %v780_v10 = vld [vmem:[#allocation2 + $0x20] sm:$0xff]  ;;  %v40_v12 = vand.u32 2147483647, %v772_v6  ;;  %vm408_vm0 = vcmask 1041408  }
  0x15   :  { %v77_v3 = vshrl.u32 %v76_v0, 7  ;;  %v782_v11 = vld [vmem:[#allocation2 + $0x28] sm:$0xff]  ;;  %v785_v13 = vld [vmem:[#allocation2 + $0x30] sm:$0xff]  ;;  %v787_v14 = vld [vmem:[#allocation2 + $0x38] sm:$0xff]  ;;  %v41_v16 = vand.u32 2147483647, %v774_v7 }
  0x16   :  { %v75_v4 = vunpack.c.0.s8 %v74_v2  ;;  %v789_v15 = vld [vmem:[#allocation2 + $0x40] sm:$0xff]  ;;  %v792_v17 = vld [vmem:[#allocation2 + $0x48] sm:$0xff]  ;;  %v794_v18 = vld [vmem:[#allocation2 + $0x50] sm:$0xff]  ;;  %v72_v20 = vcombine.high %v40_v12, %v40_v12  ;;  %v42_v24 = vand.u32 2147483647, %v776_v8  ;;  %s741_s21 = smov [#allocation6]  }
  0x17   :  { %v796_v19 = vld [vmem:[#allocation2 + $0x58] sm:$0xff]  ;;  %v801_v22 = vld [vmem:[#allocation2 + $0x60] sm:$0xff]  ;;  %v803_v23 = vld [vmem:[#allocation2 + $0x68] sm:$0xff]  ;;  %v43_v25 = vand.u32 2147483647, %v778_v9  ;;  %v89_v26 = vcombine.high %v41_v16, %v41_v16  ;;  %s630_s22 = sshll.u32 %s741_s21, 4  ;;  %s631_s22 = int_to_ptr.vmem [resolvable:$true] %s630_s22 }
  0x18   :  { %v770_v5 = vsub.s32 %v75_v4, %v77_v3  ;;  %v810_v28 = vld [vmem:[#allocation2 + $0x70] sm:$0xff]  ;;  %v812_v29 = vld [vmem:[#allocation2 + $0x78] sm:$0xff]  ;;  %v44_v30 = vand.u32 2147483647, %v780_v10  ;;  %v45_v31 = vand.u32 2147483647, %v782_v11  ;;  %v106_v48 = vcombine.high %v42_v24, %v42_v24  ;;  %p694_p9 = scmp.lt.s32.totalorder %s631_s22, %s631_s22 }
  0x19   :  { %v46_v34 = vand.u32 2147483647, %v785_v13  ;;  %v47_v35 = vand.u32 2147483647, %v787_v14  ;;  %v48_v36 = vand.u32 2147483647, %v789_v15  ;;  %v123_v50 = vcombine.high %v43_v25, %v43_v25 }
  0x1a   :  { %v799_v21 = vrot.slane %v40_v12, %v770_v5  ;;  %v808_v27 = vrot.slane %v41_v16, %v770_v5  ;;  %v817_v32 = vrot.slane %v72_v20, %v770_v5  ;;  %v825_v37 = vrot.slane %v89_v26, %v770_v5  ;;  %s689_s23 = scalar_lea.vmem %s631_s22, 16  ;;  %s693_s24 = scalar_lea.vmem %s631_s22, 32 }
  0x1b   :  { %v49_v38 = vand.u32 2147483647, %v792_v17  ;;  %v50_v39 = vand.u32 2147483647, %v794_v18  ;;  %v51_v40 = vand.u32 2147483647, %v796_v19  ;;  %v847_v49 = vrot.slane %v42_v24, %v770_v5  ;;  %p690_p8 = scmp.ne.s32.totalorder %s631_s22, %s689_s23  ;;  %p695_p10 = scmp.lt.s32.totalorder %s693_s24, %s689_s23 }
  0x1c   :  { %v87_v33 = vcombine.high %v799_v21, %v799_v21  ;;  %v88_v41 = vcombine.high %v817_v32, %v817_v32  ;;  %v52_v42 = vand.u32 2147483647, %v801_v22  ;;  %v834_v43 = vand.u32 2147483647, %v803_v23 }
  0x1d   :  { %v837_v44 = vand.u32 2147483647, %v810_v28  ;;  %v104_v45 = vcombine.high %v808_v27, %v808_v27  ;;  %v842_v46 = vand.u32 2147483647, %v812_v29  ;;  %v105_v47 = vcombine.high %v825_v37, %v825_v37  ;;  %p696_p11 = por %p695_p10, %p694_p9 }
  0x1e   :  { %v850_v51 = vrot.slane %v43_v25, %v770_v5  ;;  %v140_v52 = vcombine.high %v44_v30, %v44_v30  ;;  %v853_v53 = vrot.slane %v44_v30, %v770_v5  ;;  %v856_v54 = vrot.slane %v106_v48, %v770_v5 }
  0x1f   :  { %v121_v55 = vcombine.high %v847_v49, %v847_v49  ;;  %v157_v56 = vcombine.high %v45_v31, %v45_v31  ;;  %v861_v57 = vrot.slane %v45_v31, %v770_v5  ;;  %v864_v58 = vrot.slane %v123_v50, %v770_v5  ;;  %p697_p12 = pnand %p696_p11, %p690_p8 }
  0x20   :  { %v138_v59 = vcombine.high %v850_v51, %v850_v51  ;;  %v869_v60 = vrot.slane %v140_v52, %v770_v5  ;;  %v122_v62 = vcombine.high %v856_v54, %v856_v54  ;;  %v174_v1 = vcombine.high %v46_v34, %v46_v34 }
  0x21   :  { %v876_v63 = vrot.slane %v157_v56, %v770_v5  ;;  %v885_v4 = vrot.slane %v46_v34, %v770_v5  ;;  %v191_v12 = vcombine.high %v47_v35, %v47_v35  ;;  %v893_v24 = vrot.slane %v47_v35, %v770_v5 }
  0x22   :  { %v890_v20 = vrot.slane %v174_v1, %v770_v5  ;;  %v208_v25 = vcombine.high %v48_v36, %v48_v36  ;;  %v901_v31 = vrot.slane %v48_v36, %v770_v5  ;;  %v225_v34 = vcombine.high %v49_v38, %v49_v38 }
  0x23   :  { %v898_v30 = vrot.slane %v191_v12, %v770_v5  ;;  %v911_v52 = vrot.slane %v49_v38, %v770_v5  ;;  %v242_v12 = vcombine.high %v50_v39, %v50_v39  ;;  %v925_v50 = vrot.slane %v50_v39, %v770_v5 }
  0x24   :  { %v908_v35 = vrot.slane %v208_v25, %v770_v5  ;;  %v918_v1 = vrot.slane %v225_v34, %v770_v5  ;;  %v259_v38 = vcombine.high %v51_v40, %v51_v40  ;;  %v933_v34 = vrot.slane %v51_v40, %v770_v5 }
  0x25   :  { %v930_v26 = vrot.slane %v242_v12, %v770_v5  ;;  %v276_v36 = vcombine.high %v52_v42, %v52_v42  ;;  %v941_v39 = vrot.slane %v52_v42, %v770_v5  ;;  %v293_v25 = vcombine.high %v834_v43, %v834_v43 }
  0x26   :  { %v938_v16 = vrot.slane %v259_v38, %v770_v5  ;;  %v954_v48 = vrot.slane %v834_v43, %v770_v5  ;;  %v310_v12 = vcombine.high %v837_v44, %v837_v44  ;;  %v971_v43 = vrot.slane %v837_v44, %v770_v5 }
  0x27   :  { %v950_v56 = vrot.slane %v276_v36, %v770_v5  ;;  %v961_v0 = vrot.slane %v293_v25, %v770_v5  ;;  %v327_v42 = vcombine.high %v842_v46, %v842_v46  ;;  %v982_v3 = vrot.slane %v842_v46, %v770_v5 }
  0x28   :  { %v978_v38 = vrot.slane %v310_v12, %v770_v5  ;;  %v409_v40 = vsel %vm408_vm0, %v799_v21, -inf  ;;  %v410_v25 = vsel %vm408_vm0, %v87_v33, -inf  ;;  %v411_v12 = vsel %vm408_vm0, %v817_v32, -inf }
  0x29   :  { %v989_v36 = vrot.slane %v327_v42, %v770_v5  ;;  %v412_v5 = vsel %vm408_vm0, %v88_v41, -inf  ;;  %v413_v42 = vsel %vm408_vm0, %v808_v27, -inf  ;;  %v415_v46 = vsel %vm408_vm0, %v104_v45, -inf }
  0x2a   :  { %v414_v33 = vmax.f32 %v409_v40, %v413_v42  ;;  %v417_v61 = vsel %vm408_vm0, %v825_v37, -inf  ;;  %v416_v44 = vmax.f32 %v410_v25, %v415_v46  ;;  %v419_v32 = vsel %vm408_vm0, %v105_v47, -inf }
  0x2b   :  { %v418_v2 = vmax.f32 %v411_v12, %v417_v61  ;;  %v421_v41 = vsel %vm408_vm0, %v847_v49, -inf  ;;  %v420_v21 = vmax.f32 %v412_v5, %v419_v32  ;;  %v423_v27 = vsel %vm408_vm0, %v121_v55, -inf }
  0x2c   :  { %v422_v40 = vmax.f32 %v414_v33, %v421_v41  ;;  %v425_v45 = vsel %vm408_vm0, %v856_v54, -inf  ;;  %v424_v25 = vmax.f32 %v416_v44, %v423_v27  ;;  %v427_v37 = vsel %vm408_vm0, %v122_v62, -inf }
  0x2d   :  { %v426_v61 = vmax.f32 %v418_v2, %v425_v45  ;;  %v429_v47 = vsel %vm408_vm0, %v850_v51, -inf  ;;  %v428_v12 = vmax.f32 %v420_v21, %v427_v37  ;;  %v431_v49 = vsel %vm408_vm0, %v138_v59, -inf }
  0x2e   :  { %v430_v46 = vmax.f32 %v422_v40, %v429_v47  ;;  %v433_v55 = vsel %vm408_vm0, %v864_v58, -inf  ;;  %v432_v44 = vmax.f32 %v424_v25, %v431_v49  ;;  %v1230_v54 = vcombine.high %v864_v58, %v864_v58 }
  0x2f   :  { %v434_v2 = vmax.f32 %v426_v61, %v433_v55  ;;  %v437_v5 = vsel %vm408_vm0, %v853_v53, -inf  ;;  %v1231_v51 = vcombine.high %v853_v53, %v853_v53  ;;  %v441_v33 = vsel %vm408_vm0, %v869_v60, -inf }
  0x30   :  { %v435_v62 = vsel %vm408_vm0, %v1230_v54, -inf  ;;  %v438_v21 = vmax.f32 %v430_v46, %v437_v5  ;;  %v1232_v58 = vcombine.high %v869_v60, %v869_v60  ;;  %v445_v27 = vsel %vm408_vm0, %v861_v57, -inf }
  0x31   :  { %v436_v42 = vmax.f32 %v428_v12, %v435_v62  ;;  %v439_v59 = vsel %vm408_vm0, %v1231_v51, -inf  ;;  %v442_v41 = vmax.f32 %v434_v2, %v441_v33  ;;  %v1233_v53 = vcombine.high %v861_v57, %v861_v57 }
  0x32   :  { %v440_v32 = vmax.f32 %v432_v44, %v439_v59  ;;  %v443_v40 = vsel %vm408_vm0, %v1232_v58, -inf  ;;  %v446_v25 = vmax.f32 %v438_v21, %v445_v27  ;;  %v449_v37 = vsel %vm408_vm0, %v876_v63, -inf }
  0x33   :  { %v444_v45 = vmax.f32 %v436_v42, %v443_v40  ;;  %v447_v61 = vsel %vm408_vm0, %v1233_v53, -inf  ;;  %v450_v12 = vmax.f32 %v442_v41, %v449_v37  ;;  %v1234_v60 = vcombine.high %v876_v63, %v876_v63 }
  0x34   :  { %v448_v47 = vmax.f32 %v440_v32, %v447_v61  ;;  %v453_v49 = vsel %vm408_vm0, %v885_v4, -inf  ;;  %v1235_v57 = vcombine.high %v885_v4, %v885_v4  ;;  %v457_v54 = vsel %vm408_vm0, %v890_v20, -inf }
  0x35   :  { %v451_v46 = vsel %vm408_vm0, %v1234_v60, -inf  ;;  %v454_v44 = vmax.f32 %v446_v25, %v453_v49  ;;  %v458_v5 = vmax.f32 %v450_v12, %v457_v54  ;;  %v1236_v63 = vcombine.high %v890_v20, %v890_v20 }
  0x36   :  { %v452_v55 = vmax.f32 %v444_v45, %v451_v46  ;;  %v455_v2 = vsel %vm408_vm0, %v1235_v57, -inf  ;;  %v461_v21 = vsel %vm408_vm0, %v893_v24, -inf  ;;  %v1237_v4 = vcombine.high %v893_v24, %v893_v24 }
  0x37   :  { %v456_v62 = vmax.f32 %v448_v47, %v455_v2  ;;  %v459_v42 = vsel %vm408_vm0, %v1236_v63, -inf  ;;  %v462_v59 = vmax.f32 %v454_v44, %v461_v21  ;;  %v465_v32 = vsel %vm408_vm0, %v898_v30, -inf }
  0x38   :  { %v460_v51 = vmax.f32 %v452_v55, %v459_v42  ;;  %v463_v33 = vsel %vm408_vm0, %v1237_v4, -inf  ;;  %v466_v58 = vmax.f32 %v458_v5, %v465_v32  ;;  %v1238_v20 = vcombine.high %v898_v30, %v898_v30 }
  0x39   :  { %v464_v41 = vmax.f32 %v456_v62, %v463_v33  ;;  %v469_v27 = vsel %vm408_vm0, %v901_v31, -inf  ;;  %v1239_v24 = vcombine.high %v901_v31, %v901_v31  ;;  %v473_v61 = vsel %vm408_vm0, %v908_v35, -inf }
  0x3a   :  { %v467_v40 = vsel %vm408_vm0, %v1238_v20, -inf  ;;  %v470_v25 = vmax.f32 %v462_v59, %v469_v27  ;;  %v474_v47 = vmax.f32 %v466_v58, %v473_v61  ;;  %v1240_v30 = vcombine.high %v908_v35, %v908_v35 }
  0x3b   :  { %v468_v45 = vmax.f32 %v460_v51, %v467_v40  ;;  %v471_v53 = vsel %vm408_vm0, %v1239_v24, -inf  ;;  %v477_v60 = vsel %vm408_vm0, %v911_v52, -inf  ;;  %v1241_v31 = vcombine.high %v911_v52, %v911_v52 }
  0x3c   :  { %v472_v37 = vmax.f32 %v464_v41, %v471_v53  ;;  %v475_v12 = vsel %vm408_vm0, %v1240_v30, -inf  ;;  %v478_v49 = vmax.f32 %v470_v25, %v477_v60  ;;  %v481_v44 = vsel %vm408_vm0, %v918_v1, -inf }
  0x3d   :  { %v476_v46 = vmax.f32 %v468_v45, %v475_v12  ;;  %v479_v55 = vsel %vm408_vm0, %v1241_v31, -inf  ;;  %v482_v2 = vmax.f32 %v474_v47, %v481_v44  ;;  %v1242_v35 = vcombine.high %v918_v1, %v918_v1 }
  0x3e   :  { %v480_v57 = vmax.f32 %v472_v37, %v479_v55  ;;  %v485_v62 = vsel %vm408_vm0, %v925_v50, -inf  ;;  %v1243_v52 = vcombine.high %v925_v50, %v925_v50  ;;  %v489_v21 = vsel %vm408_vm0, %v930_v26, -inf }
  0x3f   :  { %v483_v54 = vsel %vm408_vm0, %v1242_v35, -inf  ;;  %v486_v63 = vmax.f32 %v478_v49, %v485_v62  ;;  %v490_v59 = vmax.f32 %v482_v2, %v489_v21  ;;  %v1244_v1 = vcombine.high %v930_v26, %v930_v26 }
  0x40   :  { %v484_v5 = vmax.f32 %v476_v46, %v483_v54  ;;  %v487_v42 = vsel %vm408_vm0, %v1243_v52, -inf  ;;  %v493_v33 = vsel %vm408_vm0, %v933_v34, -inf  ;;  %v1245_v50 = vcombine.high %v933_v34, %v933_v34 }
  0x41   :  { %v488_v51 = vmax.f32 %v480_v57, %v487_v42  ;;  %v491_v4 = vsel %vm408_vm0, %v1244_v1, -inf  ;;  %v494_v41 = vmax.f32 %v486_v63, %v493_v33  ;;  %v497_v20 = vsel %vm408_vm0, %v938_v16, -inf }
  0x42   :  { %v492_v32 = vmax.f32 %v484_v5, %v491_v4  ;;  %v495_v58 = vsel %vm408_vm0, %v1245_v50, -inf  ;;  %v498_v27 = vmax.f32 %v490_v59, %v497_v20  ;;  %v1246_v26 = vcombine.high %v938_v16, %v938_v16 }
  0x43   :  { %v496_v40 = vmax.f32 %v488_v51, %v495_v58  ;;  %v501_v25 = vsel %vm408_vm0, %v941_v39, -inf  ;;  %v1247_v34 = vcombine.high %v941_v39, %v941_v39  ;;  %v505_v37 = vsel %vm408_vm0, %v950_v56, -inf }
  0x44   :  { %v499_v45 = vsel %vm408_vm0, %v1246_v26, -inf  ;;  %v502_v53 = vmax.f32 %v494_v41, %v501_v25  ;;  %v506_v30 = vmax.f32 %v498_v27, %v505_v37  ;;  %v1248_v16 = vcombine.high %v950_v56, %v950_v56 }
  0x45   :  { %v500_v24 = vmax.f32 %v492_v32, %v499_v45  ;;  %v503_v61 = vsel %vm408_vm0, %v1247_v34, -inf  ;;  %v509_v60 = vsel %vm408_vm0, %v954_v48, -inf  ;;  %v1249_v39 = vcombine.high %v954_v48, %v954_v48 }
  0x46   :  { %v504_v47 = vmax.f32 %v496_v40, %v503_v61  ;;  %v507_v12 = vsel %vm408_vm0, %v1248_v16, -inf  ;;  %v510_v49 = vmax.f32 %v502_v53, %v509_v60  ;;  %v513_v55 = vsel %vm408_vm0, %v961_v0, -inf }
  0x47   :  { %v508_v46 = vmax.f32 %v500_v24, %v507_v12  ;;  %v511_v31 = vsel %vm408_vm0, %v1249_v39, -inf  ;;  %v514_v57 = vmax.f32 %v506_v30, %v513_v55  ;;  %v1250_v56 = vcombine.high %v961_v0, %v961_v0 }
  0x48   :  { %v512_v44 = vmax.f32 %v504_v47, %v511_v31  ;;  %v517_v35 = vsel %vm408_vm0, %v971_v43, -inf  ;;  %v1251_v48 = vcombine.high %v971_v43, %v971_v43  ;;  %v521_v63 = vsel %vm408_vm0, %v978_v38, -inf }
  0x49   :  { %v515_v2 = vsel %vm408_vm0, %v1250_v56, -inf  ;;  %v518_v62 = vmax.f32 %v510_v49, %v517_v35  ;;  %v522_v42 = vmax.f32 %v514_v57, %v521_v63  ;;  %v1252_v0 = vcombine.high %v978_v38, %v978_v38 }
  0x4a   :  { %v516_v54 = vmax.f32 %v508_v46, %v515_v2  ;;  %v519_v5 = vsel %vm408_vm0, %v1251_v48, -inf  ;;  %v525_v51 = vsel %vm408_vm0, %v982_v3, -inf  ;;  %v1253_v43 = vcombine.high %v982_v3, %v982_v3 }
  0x4b   :  { %v520_v52 = vmax.f32 %v512_v44, %v519_v5  ;;  %v523_v21 = vsel %vm408_vm0, %v1252_v0, -inf  ;;  %v526_v1 = vmax.f32 %v518_v62, %v525_v51  ;;  %v529_v33 = vsel %vm408_vm0, %v989_v36, -inf }
  0x4c   :  { %v524_v59 = vmax.f32 %v516_v54, %v523_v21  ;;  %v527_v4 = vsel %vm408_vm0, %v1253_v43, -inf  ;;  %v530_v41 = vmax.f32 %v522_v42, %v529_v33  ;;  %v1254_v38 = vcombine.high %v989_v36, %v989_v36 }
  0x4d   :  { %v528_v32 = vmax.f32 %v520_v52, %v527_v4  ;;  %vm612_vm1 = vcmask 0  }
  0x4e   :  { %v531_v50 = vsel %vm408_vm0, %v1254_v38, -inf }
  0x4f   :  { %v532_v58 = vmax.f32 %v524_v59, %v531_v50  ;;  %v533_v20 = vmax.f32 %v526_v1, %v528_v32 }
  0x51   :  { %v534_v40 = vmax.f32 %v530_v41, %v532_v58 }
  0x53   :  { %v535_v27 = vmax.f32 %v533_v20, %v534_v40 }
  0x55   :  { %536 = vmax.xlane.f32.xlu0 %v535_v27 }
  0xe2   :  { %v537_v26 = vpop.xlane.xlu0 %536 }
  0xe3   :  { %v538_v45 = vrot.slane %v537_v26, 4 }
  0xe5   :  { %v539_v3 = vmax.f32 %v537_v26, %v538_v45 }
  0xe7   :  { %v540_v25 = vrot.slane %v539_v3, 2 }
  0xe9   :  { %v541_v24 = vmax.f32 %v539_v3, %v540_v25 }
  0xeb   :  { %v542_v53 = vrot.slane %v541_v24, 1 }
  0xed   :  { %v543_v34 = vmax.f32 %v541_v24, %v542_v53 }
  0xef   :  { %659 = vpush %v543_v34 }
 0x120   :  { %s660_s0 = spop %659 }
 0x121   :  { %v545_v61 = vstv %s660_s0 }
 0x122   :  { %665 = vrcp.f32 %v545_v61 }
 0x12c   :  { %v666_v36 = vpop.eup %665 }
 0x12d   :  { %v547_v37 = vmul.f32 255.0, %v666_v36 }
 0x12f   :  { %v548_v47 = vmul.f32 %v547_v37, %v772_v6  ;;  %v549_v30 = vmul.f32 %v547_v37, %v774_v7  ;;  %v550_v16 = vmul.f32 %v547_v37, %v776_v8  ;;  %v551_v12 = vmul.f32 %v547_v37, %v778_v9  ;;  %613 = vst.msk [vmem:[#allocation6] sm:$0x1] %vm612_vm1, %v547_v37 }
 0x130   :  { %v552_v60 = vmul.f32 %v547_v37, %v780_v10  ;;  %v553_v46 = vmul.f32 %v547_v37, %v782_v11  ;;  %v554_v49 = vmul.f32 %v547_v37, %v785_v13  ;;  %v555_v39 = vmul.f32 %v547_v37, %v787_v14 }
 0x131   :  { %700 = shalt.err (!%p697_p12)
}
 0x132   :  { %s701_s27 = scalar_lea.hbm %s1229_s2, 16 }
 0x133   :  { %p702_p13 = scmp.ne.s32.totalorder %s1229_s2, %s701_s27  ;;  %p705_p0 = scmp.lt.u32.totalorder %s701_s27, %s1229_s2 }
 0x135   :  { %p707_p1 = pnand %p705_p0, %p702_p13 }
 0x137   :  { %710 = shalt.err (!%p707_p1)
}
 0x138   :  { %633 = dma.vmem_to_hbm [thread:$0]  %s631_s22, 16, %s1229_s2, [#allocation7]   ;;  %v556_v6 = vmul.f32 %v547_v37, %v789_v15  ;;  %v557_v7 = vmul.f32 %v547_v37, %v792_v17  ;;  %v558_v8 = vmul.f32 %v547_v37, %v794_v18  ;;  %v559_v9 = vmul.f32 %v547_v37, %v796_v19 }
 0x139   :  { %v560_v10 = vmul.f32 %v547_v37, %v801_v22  ;;  %v561_v11 = vmul.f32 %v547_v37, %v803_v23  ;;  %v562_v13 = vmul.f32 %v547_v37, %v810_v28  ;;  %v563_v14 = vmul.f32 %v547_v37, %v812_v29  ;;  %s742_s2 = smov [#allocation5]  }
 0x13a   :  { %v564_v31 = vadd.f32 12582912.0, %v548_v47  ;;  %v565_v55 = vadd.f32 12582912.0, %v549_v30  ;;  %v566_v44 = vadd.f32 12582912.0, %v550_v16  ;;  %v567_v57 = vadd.f32 12582912.0, %v551_v12  ;;  %s620_s6 = sshll.u32 %s742_s2, 4  ;;  %s621_s6 = int_to_ptr.vmem [resolvable:$true] %s620_s6 }
 0x13b   :  { %v568_v56 = vadd.f32 12582912.0, %v552_v60  ;;  %v569_v15 = vadd.f32 12582912.0, %v553_v46  ;;  %v570_v2 = vadd.f32 12582912.0, %v554_v49  ;;  %v571_v17 = vadd.f32 12582912.0, %v555_v39  ;;  %s711_s7 = scalar_lea.vmem %s621_s6, 2048  ;;  %p716_p3 = scmp.lt.s32.totalorder %s621_s6, %s621_s6 }
 0x13c   :  { %v572_v35 = vadd.f32 12582912.0, %v556_v6  ;;  %v573_v18 = vadd.f32 12582912.0, %v557_v7  ;;  %v574_v54 = vadd.f32 12582912.0, %v558_v8  ;;  %v575_v19 = vadd.f32 12582912.0, %v559_v9  ;;  %p712_p2 = scmp.ne.s32.totalorder %s621_s6, %s711_s7  ;;  %p717_p4 = scmp.lt.s32.totalorder %s711_s7, %s711_s7 }
 0x13d   :  { %v576_v62 = vadd.f32 12582912.0, %v560_v10  ;;  %v577_v22 = vadd.f32 12582912.0, %v561_v11  ;;  %v578_v48 = vadd.f32 12582912.0, %v562_v13  ;;  %v579_v23 = vadd.f32 12582912.0, %v563_v14 }
 0x13e   :  { %v643_v5 = vadd.f32 -12582912.0, %v564_v31  ;;  %v644_v28 = vadd.f32 -12582912.0, %v565_v55  ;;  %v645_v63 = vadd.f32 -12582912.0, %v566_v44  ;;  %v646_v29 = vadd.f32 -12582912.0, %v567_v57  ;;  %p718_p5 = por %p717_p4, %p716_p3 }
 0x13f   :  { %v647_v52 = vadd.f32 -12582912.0, %v568_v56  ;;  %v648_v42 = vadd.f32 -12582912.0, %v569_v15  ;;  %v649_v0 = vadd.f32 -12582912.0, %v570_v2  ;;  %v650_v21 = vadd.f32 -12582912.0, %v571_v17 }
 0x140   :  { %v651_v51 = vadd.f32 -12582912.0, %v572_v35  ;;  %v652_v59 = vadd.f32 -12582912.0, %v573_v18  ;;  %v653_v1 = vadd.f32 -12582912.0, %v574_v54  ;;  %v654_v43 = vadd.f32 -12582912.0, %v575_v19  ;;  %596 = vst [vmem:[#allocation5] sm:$0xff] %v643_v5  ;;  %597 = vst [vmem:[#allocation5 + $0x8] sm:$0xff] %v644_v28  ;;  %p719_p6 = pnand %p718_p5, %p712_p2 }
 0x141   :  { %598 = vst [vmem:[#allocation5 + $0x10] sm:$0xff] %v645_v63  ;;  %599 = vst [vmem:[#allocation5 + $0x18] sm:$0xff] %v646_v29  ;;  %v655_v4 = vadd.f32 -12582912.0, %v576_v62  ;;  %v656_v33 = vadd.f32 -12582912.0, %v577_v22  ;;  %v657_v32 = vadd.f32 -12582912.0, %v578_v48  ;;  %v658_v41 = vadd.f32 -12582912.0, %v579_v23 }
 0x142   :  { %600 = vst [vmem:[#allocation5 + $0x20] sm:$0xff] %v647_v52  ;;  %601 = vst [vmem:[#allocation5 + $0x28] sm:$0xff] %v648_v42 }
 0x143   :  { %602 = vst [vmem:[#allocation5 + $0x30] sm:$0xff] %v649_v0  ;;  %603 = vst [vmem:[#allocation5 + $0x38] sm:$0xff] %v650_v21 }
 0x144   :  { %604 = vst [vmem:[#allocation5 + $0x40] sm:$0xff] %v651_v51  ;;  %605 = vst [vmem:[#allocation5 + $0x48] sm:$0xff] %v652_v59 }
 0x145   :  { %606 = vst [vmem:[#allocation5 + $0x50] sm:$0xff] %v653_v1  ;;  %607 = vst [vmem:[#allocation5 + $0x58] sm:$0xff] %v654_v43 }
 0x146   :  { %608 = vst [vmem:[#allocation5 + $0x60] sm:$0xff] %v655_v4  ;;  %609 = vst [vmem:[#allocation5 + $0x68] sm:$0xff] %v656_v33 }
 0x147   :  { %610 = vst [vmem:[#allocation5 + $0x70] sm:$0xff] %v657_v32  ;;  %611 = vst [vmem:[#allocation5 + $0x78] sm:$0xff] %v658_v41 }
 0x148   :  { %722 = shalt.err (!%p719_p6)
}
 0x149   :  { %s723_s10 = scalar_lea.hbm %s1228_s1, 2048 }
 0x14a   :  { %p724_p7 = scmp.ne.s32.totalorder %s1228_s1, %s723_s10  ;;  %p727_p8 = scmp.lt.u32.totalorder %s723_s10, %s1228_s1 }
 0x14c   :  { %p729_p9 = pnand %p727_p8, %p724_p7 }
 0x14e   :  { %732 = shalt.err (!%p729_p9)
}
 0x14f   :  { %623 = dma.vmem_to_hbm [thread:$0]  %s621_s6, 2048, %s1228_s1, [#allocation4]  }
 0x150   :  { %735 = dma.done.wait [#allocation4], 2048  }
 0x151   :  { %736 = vsyncadd [#allocation4], 4294965248 }
 0x152   :  { %737 = dma.done.wait [#allocation7], 16  }
 0x153   :  { %738 = vsyncadd [#allocation7], 4294967280 }
 0x154   :  { %640 = vsyncpa [#allocation3], 1 }
 0x155   :  { %641 = vsyncpa [#allocation4], 1 }
 0x156   :  { %642 = vsyncpa [#allocation7], 1 }

</bundles_post_ra>
